<compile_context>
chip_gen: v7x
topology: tpu7x:2x2x1
jax: 0.10.0
libtpu: 0.0.40
codegen_flags: <defaults>
</compile_context>

<pallas_src>
import jax
import jax.numpy as jnp
from jax.experimental import pallas as pl
from jax.experimental.pallas import tpu as pltpu


def _round_up(v, m):
    return (v + m - 1) // m * m


# ----------------------------------------------------------------------------
# Pallas kernel: fused, batch-packed ChebConv + bias + ELU + Pool (one group
# of batches per grid step; the group axis is "parallel").
# ----------------------------------------------------------------------------
def _make_enblock_kernel(K):
    def kernel(x_ref, lhat_ref, wbig_ref, bias_ref, down_ref, o_ref):
        cdtype = x_ref.dtype

        # Chebyshev recurrence with per-order accumulation (no concatenate).
        t_prev = x_ref[...]                                        # T_0 [Np,Cp]
        acc = jnp.dot(t_prev, wbig_ref[0],
                      preferred_element_type=jnp.float32)          # [Np,Co] f32
        if K > 1:
            lhat = lhat_ref[...]                                   # [Np, Np]
            t_cur = jnp.dot(lhat, t_prev,
                            preferred_element_type=jnp.float32).astype(cdtype)
            acc = acc + jnp.dot(t_cur, wbig_ref[1],
                                preferred_element_type=jnp.float32)
            for k in range(2, K):
                # NOTE: T_k is kept in the input dtype (bf16 fast path on the
                # MXU); accumulation of each product is in f32.
                t_next = (2.0 * jnp.dot(lhat, t_cur,
                                        preferred_element_type=jnp.float32)
                          - t_prev.astype(jnp.float32)).astype(cdtype)
                acc = acc + jnp.dot(t_next, wbig_ref[k],
                                    preferred_element_type=jnp.float32)
                t_prev, t_cur = t_cur, t_next

        # Bias: single VPU add (no bias lane inflating Cp).
        acc = acc + bias_ref[0:1, :].astype(jnp.float32)           # bcast [1,Co]

        # ELU (alpha = 1): Taylor-blended expm1 for small |x|, clamped exp so
        # the EUP never sees positive arguments.
        xneg = jnp.minimum(acc, 0.0)
        em1 = jnp.where(xneg > -1e-3,
                        xneg * (1.0 + 0.5 * xneg),
                        jnp.exp(xneg) - 1.0)
        act = jnp.where(acc > 0.0, acc, em1)

        # Pool: one lane-dense matmul; operand cast back to the input dtype so
        # a bf16 caller keeps the fast MXU path.
        o_ref[...] = jnp.dot(down_ref[...], act.astype(cdtype),
                             preferred_element_type=jnp.float32
                             ).astype(o_ref.dtype)                 # [Mp, Co]
    return kernel


def _choose_batch_group(B, Fin, Fout, max_in_lanes=256, max_out_lanes=512):
    """Batches per group so the block-diagonal weight stays bounded (~O(B))."""
    per_in = max(1, max_in_lanes // max(Fin, 1))
    per_out = max(1, max_out_lanes // max(Fout, 1))
    return max(1, min(B, per_in, per_out))


def enblock_forward(x, lhat, weight, bias, down):
    """x: [B, N, Fin], lhat: [N, N], weight: [K, Fin, Fout], bias: [Fout],
    down: [M, N]  ->  out: [B, M, Fout].  Compute dtype follows x."""
    B, N, Fin = x.shape
    K, _, Fout = weight.shape
    M = down.shape[0]
    dtype = x.dtype
    itemsize = jnp.dtype(dtype).itemsize

    # Batch grouping -> parallel grid axis; bounds per-group lane widths.
    Bg = _choose_batch_group(B, Fin, Fout)
    G = -(-B // Bg)
    Bp = G * Bg

    # Lane-dense, (8,128)-aligned shapes (node dims padded to full 128 lanes).
    Np = _round_up(N, 128)
    Mp = _round_up(M, 8)
    Cp = _round_up(Bg * Fin, 128)          # recurrence lane width per group
    Co = _round_up(Bg * Fout, 128)         # dense (b*Fout) output lanes/group

    # ---- host-side packing (pure XLA glue; cache/jit alongside the weights).
    x_pad = jnp.zeros((Bp, N, Fin), dtype).at[:B].set(x.astype(dtype))
    xg = (x_pad.reshape(G, Bg, N, Fin).transpose(0, 2, 1, 3)
          .reshape(G, N, Bg * Fin))
    x_pack = jnp.zeros((G, Np, Cp), dtype).at[:, :N, :Bg * Fin].set(xg)

    lhat_p = jnp.zeros((Np, Np), dtype).at[:N, :N].set(lhat.astype(dtype))
    down_p = jnp.zeros((Mp, Np), dtype).at[:M, :N].set(down.astype(dtype))

    # Block-diagonal per-group weight, built with one einsum (no per-batch
    # dynamic-update-slice loop): wbig[k, b*Fin+f, b*Fout+o] = weight[k, f, o].
    eye = jnp.eye(Bg, dtype=jnp.float32)
    wb = jnp.einsum("bc,kfo->kbfco", eye, weight.astype(jnp.float32))
    wb = wb.reshape(K, Bg * Fin, Bg * Fout).astype(dtype)
    wbig = jnp.zeros((K, Cp, Co), dtype).at[:, :Bg * Fin, :Bg * Fout].set(wb)

    bias_row = jnp.tile(bias.astype(dtype), Bg)                    # [Bg*Fout]
    bias_pack = jnp.zeros((8, Co), dtype).at[:, :Bg * Fout].set(
        jnp.broadcast_to(bias_row, (8, Bg * Fout)))

    # ---- cost estimate & scoped-VMEM sizing. ----
    cost = pl.CostEstimate(
        flops=int(G * (2 * Np * Np * Cp * max(K - 1, 0)    # recurrence
                       + 2 * Np * Cp * Co * K              # feature matmuls
                       + 2 * Mp * Np * Co)),               # pooling
        transcendentals=int(G * Np * Co),                  # ELU exp
        bytes_accessed=int(itemsize * (G * Np * Cp + Np * Np + K * Cp * Co
                                       + 8 * Co + Mp * Np + G * Mp * Co)),
    )
    resident = itemsize * (2 * Np * Cp            # x block (double-buffered)
                           + 2 * Mp * Co          # out block (double-buffered)
                           + Np * Np + K * Cp * Co + 8 * Co + Mp * Np)
    temps = 4 * (2 * Np * Cp + 2 * Np * Co + Mp * Co)      # f32 temporaries
    vmem_limit = int(min(max(2 * resident + temps + (1 << 20), 32 << 20),
                         64 << 20))

    out_p = pl.pallas_call(
        _make_enblock_kernel(K),
        out_shape=jax.ShapeDtypeStruct((G, Mp, Co), dtype),
        grid=(G,),
        in_specs=[
            pl.BlockSpec((None, Np, Cp), lambda g: (g, 0, 0)),   # x (per group)
            pl.BlockSpec((Np, Np), lambda g: (0, 0)),            # lhat (shared)
            pl.BlockSpec((K, Cp, Co), lambda g: (0, 0, 0)),      # wbig (shared)
            pl.BlockSpec((8, Co), lambda g: (0, 0)),             # bias (shared)
            pl.BlockSpec((Mp, Np), lambda g: (0, 0)),            # down (shared)
        ],
        out_specs=pl.BlockSpec((None, Mp, Co), lambda g: (g, 0, 0)),
        compiler_params=pltpu.CompilerParams(
            dimension_semantics=("parallel",),
            vmem_limit_bytes=vmem_limit),
        cost_estimate=cost,
    )(x_pack, lhat_p, wbig, bias_pack, down_p)

    # Strip padding and restore [B, M, Fout].
    out = out_p[:, :M, :Bg * Fout]
    out = (out.reshape(G, M, Bg, Fout).transpose(0, 2, 1, 3)
           .reshape(Bp, M, Fout))
    return out[:B]


# ----------------------------------------------------------------------------
# Plain-JAX glue: graph preprocessing, init, and a pure-JAX reference
# ----------------------------------------------------------------------------
def scaled_laplacian_from_edge_index(edge_index, num_nodes, lambda_max=2.0):
    """L_hat = 2/lambda_max * (I - D^-1/2 A D^-1/2) - I (ChebConv 'sym')."""
    row, col = edge_index[0], edge_index[1]
    adj = jnp.zeros((num_nodes, num_nodes), jnp.float32)
    adj = adj.at[row, col].set(1.0)
    deg = jnp.sum(adj, axis=1)
    dinv_sqrt = jnp.where(deg > 0, 1.0 / jnp.sqrt(jnp.maximum(deg, 1e-12)), 0.0)
    a_norm = dinv_sqrt[:, None] * adj * dinv_sqrt[None, :]
    lap = jnp.eye(num_nodes, dtype=jnp.float32) - a_norm
    return (2.0 / lambda_max) * lap - jnp.eye(num_nodes, dtype=jnp.float32)


def xavier_uniform(key, shape, fan_in, fan_out):
    bound = (6.0 / (fan_in + fan_out)) ** 0.5
    return jax.random.uniform(key, shape, jnp.float32, -bound, bound)


def reference_forward(x, lhat, weight, bias, down):
    """Pure-JAX reference of ChebConv -> ELU -> Pool."""
    K = weight.shape[0]
    tx_prev = x
    out = jnp.einsum("bnf,fo->bno", tx_prev, weight[0])
    if K > 1:
        tx_cur = jnp.einsum("nm,bmf->bnf", lhat, tx_prev)
        out = out + jnp.einsum("bnf,fo->bno", tx_cur, weight[1])
        for k in range(2, K):
            tx_next = 2.0 * jnp.einsum("nm,bmf->bnf", lhat, tx_cur) - tx_prev
            out = out + jnp.einsum("bnf,fo->bno", tx_next, weight[k])
            tx_prev, tx_cur = tx_cur, tx_next
    out = out + bias[None, None, :]
    out = jnp.where(out > 0, out, jnp.expm1(out))                  # ELU
    return jnp.einsum("mn,bno->bmo", down, out)                    # Pool


# ----------------------------------------------------------------------------
if __name__ == "__main__":
    B, N, Fin, Fout, K, M = 2, 16, 4, 32, 3, 8

    key = jax.random.PRNGKey(0)
    k_x, k_w, k_b = jax.random.split(key, 3)

    # Input features.
    x = jax.random.normal(k_x, (B, N, Fin), jnp.float32)

    # Ring graph on N vertices (undirected -> both directions).
    src = jnp.arange(N, dtype=jnp.int32)
    dst = (src + 1) % N
    edge_index = jnp.stack(
        [jnp.concatenate([src, dst]), jnp.concatenate([dst, src])], axis=0)

    # Sparse down_transform (densified): output vertex r averages inputs 2r, 2r+1.
    down = jnp.zeros((M, N), jnp.float32)
    rows = jnp.arange(M, dtype=jnp.int32)
    down = down.at[rows, 2 * rows].set(0.5)
    down = down.at[rows, 2 * rows + 1].set(0.5)

    # ChebConv parameters (reset_parameters: xavier_uniform weight, zero bias).
    weight = xavier_uniform(k_w, (K, Fin, Fout), fan_in=Fin, fan_out=Fout)
    bias = jnp.zeros((Fout,), jnp.float32)

    # Graph preprocessing glue.
    lhat = scaled_laplacian_from_edge_index(edge_index, N)

    # f32 path (bit-level check against the pure-JAX reference).
    out = jax.block_until_ready(enblock_forward(x, lhat, weight, bias, down))
    ref = reference_forward(x, lhat, weight, bias, down)
    assert out.shape == (B, M, Fout)
    assert jnp.allclose(out, ref, atol=3e-5, rtol=3e-5), \
        float(jnp.max(jnp.abs(out - ref)))

    # Non-zero bias exercises the VPU bias add.
    bias2 = 0.1 * jax.random.normal(k_b, (Fout,), jnp.float32)
    out2 = jax.block_until_ready(enblock_forward(x, lhat, weight, bias2, down))
    ref2 = reference_forward(x, lhat, weight, bias2, down)
    assert jnp.allclose(out2, ref2, atol=3e-5, rtol=3e-5), \
        float(jnp.max(jnp.abs(out2 - ref2)))

    # bf16 fast path (bf16 MXU operands everywhere, f32 accumulation).
    out_bf = jax.block_until_ready(
        enblock_forward(x.astype(jnp.bfloat16), lhat, weight, bias2, down))
    assert out_bf.dtype == jnp.bfloat16 and out_bf.shape == (B, M, Fout)
    assert jnp.allclose(out_bf.astype(jnp.float32), ref2, atol=1e-1, rtol=1e-1), \
        float(jnp.max(jnp.abs(out_bf.astype(jnp.float32) - ref2)))

    print("KERNEL_OK")
</pallas_src>

<mosaic_0001>
module attributes {stable_mosaic.version = 11 : i64} {
  func.func @kernel(%arg0: i32, %arg1: memref<1x128x128xf32, #tpu.memory_space<vmem>>, %arg2: memref<128x128xf32, #tpu.memory_space<vmem>>, %arg3: memref<3x128x128xf32, #tpu.memory_space<vmem>>, %arg4: memref<8x128xf32, #tpu.memory_space<vmem>>, %arg5: memref<8x128xf32, #tpu.memory_space<vmem>>, %arg6: memref<1x8x128xf32, #tpu.memory_space<vmem>>) attributes {dimension_semantics = [#tpu.dimension_semantics<parallel>], iteration_bounds = array<i64: 1>, scalar_prefetch = 0 : i64, scratch_operands = 0 : i64, tpu.core_type = #tpu.core_type<tc>, window_params = [{transform_indices = @transform_0, window_bounds = array<i64: 1, 128, 128>}, {pipeline_mode = #tpu.pipeline_mode<synchronous>, transform_indices = @transform_1, window_bounds = array<i64: 128, 128>}, {pipeline_mode = #tpu.pipeline_mode<synchronous>, transform_indices = @transform_2, window_bounds = array<i64: 3, 128, 128>}, {pipeline_mode = #tpu.pipeline_mode<synchronous>, transform_indices = @transform_3, window_bounds = array<i64: 8, 128>}, {pipeline_mode = #tpu.pipeline_mode<synchronous>, transform_indices = @transform_4, window_bounds = array<i64: 8, 128>}, {transform_indices = @transform_5, window_bounds = array<i64: 1, 8, 128>}]} {
    %c0 = arith.constant 0 : index
    %c0_0 = arith.constant 0 : index
    %c0_1 = arith.constant 0 : index
    %0 = vector.load %arg1[%c0, %c0_0, %c0_1] : memref<1x128x128xf32, #tpu.memory_space<vmem>>, vector<1x128x128xf32>
    %1 = vector.shape_cast %0 : vector<1x128x128xf32> to vector<128x128xf32>
    %c0_2 = arith.constant 0 : index
    %c0_3 = arith.constant 0 : index
    %c0_4 = arith.constant 0 : index
    %2 = vector.load %arg3[%c0_2, %c0_3, %c0_4] : memref<3x128x128xf32, #tpu.memory_space<vmem>>, vector<1x128x128xf32>
    %3 = vector.shape_cast %2 : vector<1x128x128xf32> to vector<128x128xf32>
    %cst = arith.constant dense<0.000000e+00> : vector<128x128xf32>
    %4 = tpu.matmul %1, %3, %cst {dimension_numbers = #tpu.dot_dimension_numbers<[1], [0], [0], [1], [0, 0, 1, 1], [], []>} : vector<128x128xf32>, vector<128x128xf32>, vector<128x128xf32> -> vector<128x128xf32>
    %c0_5 = arith.constant 0 : index
    %c0_6 = arith.constant 0 : index
    %5 = vector.load %arg2[%c0_5, %c0_6] : memref<128x128xf32, #tpu.memory_space<vmem>>, vector<128x128xf32>
    %cst_7 = arith.constant dense<0.000000e+00> : vector<128x128xf32>
    %6 = tpu.matmul %5, %1, %cst_7 {dimension_numbers = #tpu.dot_dimension_numbers<[1], [0], [0], [1], [0, 0, 1, 1], [], []>} : vector<128x128xf32>, vector<128x128xf32>, vector<128x128xf32> -> vector<128x128xf32>
    %c1 = arith.constant 1 : index
    %c0_8 = arith.constant 0 : index
    %c0_9 = arith.constant 0 : index
    %7 = vector.load %arg3[%c1, %c0_8, %c0_9] : memref<3x128x128xf32, #tpu.memory_space<vmem>>, vector<1x128x128xf32>
    %8 = vector.shape_cast %7 : vector<1x128x128xf32> to vector<128x128xf32>
    %cst_10 = arith.constant dense<0.000000e+00> : vector<128x128xf32>
    %9 = tpu.matmul %6, %8, %cst_10 {dimension_numbers = #tpu.dot_dimension_numbers<[1], [0], [0], [1], [0, 0, 1, 1], [], []>} : vector<128x128xf32>, vector<128x128xf32>, vector<128x128xf32> -> vector<128x128xf32>
    %10 = arith.addf %4, %9 : vector<128x128xf32>
    %cst_11 = arith.constant dense<0.000000e+00> : vector<128x128xf32>
    %11 = tpu.matmul %5, %6, %cst_11 {dimension_numbers = #tpu.dot_dimension_numbers<[1], [0], [0], [1], [0, 0, 1, 1], [], []>} : vector<128x128xf32>, vector<128x128xf32>, vector<128x128xf32> -> vector<128x128xf32>
    %cst_12 = arith.constant 2.000000e+00 : f32
    %12 = vector.broadcast %cst_12 : f32 to vector<128x128xf32>
    %13 = arith.mulf %12, %11 : vector<128x128xf32>
    %14 = arith.subf %13, %1 : vector<128x128xf32>
    %c2 = arith.constant 2 : index
    %c0_13 = arith.constant 0 : index
    %c0_14 = arith.constant 0 : index
    %15 = vector.load %arg3[%c2, %c0_13, %c0_14] : memref<3x128x128xf32, #tpu.memory_space<vmem>>, vector<1x128x128xf32>
    %16 = vector.shape_cast %15 : vector<1x128x128xf32> to vector<128x128xf32>
    %cst_15 = arith.constant dense<0.000000e+00> : vector<128x128xf32>
    %17 = tpu.matmul %14, %16, %cst_15 {dimension_numbers = #tpu.dot_dimension_numbers<[1], [0], [0], [1], [0, 0, 1, 1], [], []>} : vector<128x128xf32>, vector<128x128xf32>, vector<128x128xf32> -> vector<128x128xf32>
    %18 = arith.addf %10, %17 : vector<128x128xf32>
    %c0_16 = arith.constant 0 : index
    %c0_17 = arith.constant 0 : index
    %19 = vector.load %arg4[%c0_16, %c0_17] : memref<8x128xf32, #tpu.memory_space<vmem>>, vector<1x128xf32>
    %20 = vector.broadcast %19 : vector<1x128xf32> to vector<128x128xf32>
    %21 = arith.addf %18, %20 : vector<128x128xf32>
    %cst_18 = arith.constant 0.000000e+00 : f32
    %22 = vector.broadcast %cst_18 : f32 to vector<128x128xf32>
    %23 = arith.minimumf %21, %22 : vector<128x128xf32>
    %cst_19 = arith.constant -1.000000e-03 : f32
    %24 = vector.broadcast %cst_19 : f32 to vector<128x128xf32>
    %25 = arith.cmpf ogt, %23, %24 : vector<128x128xf32>
    %cst_20 = arith.constant 5.000000e-01 : f32
    %26 = vector.broadcast %cst_20 : f32 to vector<128x128xf32>
    %27 = arith.mulf %26, %23 : vector<128x128xf32>
    %cst_21 = arith.constant 1.000000e+00 : f32
    %28 = vector.broadcast %cst_21 : f32 to vector<128x128xf32>
    %29 = arith.addf %28, %27 : vector<128x128xf32>
    %30 = arith.mulf %23, %29 : vector<128x128xf32>
    %31 = math.exp %23 : vector<128x128xf32>
    %cst_22 = arith.constant 1.000000e+00 : f32
    %32 = vector.broadcast %cst_22 : f32 to vector<128x128xf32>
    %33 = arith.subf %31, %32 : vector<128x128xf32>
    %34 = arith.select %25, %30, %33 : vector<128x128xi1>, vector<128x128xf32>
    %cst_23 = arith.constant 0.000000e+00 : f32
    %35 = vector.broadcast %cst_23 : f32 to vector<128x128xf32>
    %36 = arith.cmpf ogt, %21, %35 : vector<128x128xf32>
    %37 = arith.select %36, %21, %34 : vector<128x128xi1>, vector<128x128xf32>
    %c0_24 = arith.constant 0 : index
    %c0_25 = arith.constant 0 : index
    %38 = vector.load %arg5[%c0_24, %c0_25] : memref<8x128xf32, #tpu.memory_space<vmem>>, vector<8x128xf32>
    %cst_26 = arith.constant dense<0.000000e+00> : vector<8x128xf32>
    %39 = tpu.matmul %38, %37, %cst_26 {dimension_numbers = #tpu.dot_dimension_numbers<[1], [0], [0], [1], [0, 0, 1, 1], [], []>} : vector<8x128xf32>, vector<128x128xf32>, vector<8x128xf32> -> vector<8x128xf32>
    %c0_27 = arith.constant 0 : index
    %c0_28 = arith.constant 0 : index
    %c0_29 = arith.constant 0 : index
    %40 = vector.load %arg6[%c0_27, %c0_28, %c0_29] : memref<1x8x128xf32, #tpu.memory_space<vmem>>, vector<1x8x128xf32>
    %41 = vector.shape_cast %40 : vector<1x8x128xf32> to vector<8x128xf32>
    %42 = vector.shape_cast %39 : vector<8x128xf32> to vector<1x8x128xf32>
    tpu.vector_store %arg6[%c0_27, %c0_28, %c0_29], %42 {strides = array<i32>} : memref<1x8x128xf32, #tpu.memory_space<vmem>>, vector<1x8x128xf32>,
    return
  }
  func.func @transform_0(%arg0: i32) -> (i32, i32, i32) {
    %c0_i32 = arith.constant 0 : i32
    %c0_i32_0 = arith.constant 0 : i32
    %c0_i32_1 = arith.constant 0 : i32
    return %arg0, %c0_i32, %c0_i32_0 : i32, i32, i32
  }
  func.func @transform_1(%arg0: i32) -> (i32, i32) {
    %c0_i32 = arith.constant 0 : i32
    %c0_i32_0 = arith.constant 0 : i32
    %c0_i32_1 = arith.constant 0 : i32
    return %c0_i32, %c0_i32_0 : i32, i32
  }
  func.func @transform_2(%arg0: i32) -> (i32, i32, i32) {
    %c0_i32 = arith.constant 0 : i32
    %c0_i32_0 = arith.constant 0 : i32
    %c0_i32_1 = arith.constant 0 : i32
    %c0_i32_2 = arith.constant 0 : i32
    return %c0_i32, %c0_i32_0, %c0_i32_1 : i32, i32, i32
  }
  func.func @transform_3(%arg0: i32) -> (i32, i32) {
    %c0_i32 = arith.constant 0 : i32
    %c0_i32_0 = arith.constant 0 : i32
    %c0_i32_1 = arith.constant 0 : i32
    return %c0_i32, %c0_i32_0 : i32, i32
  }
  func.func @transform_4(%arg0: i32) -> (i32, i32) {
    %c0_i32 = arith.constant 0 : i32
    %c0_i32_0 = arith.constant 0 : i32
    %c0_i32_1 = arith.constant 0 : i32
    return %c0_i32, %c0_i32_0 : i32, i32
  }
  func.func @transform_5(%arg0: i32) -> (i32, i32, i32) {
    %c0_i32 = arith.constant 0 : i32
    %c0_i32_0 = arith.constant 0 : i32
    %c0_i32_1 = arith.constant 0 : i32
    return %arg0, %c0_i32, %c0_i32_0 : i32, i32, i32
  }
}

</mosaic_0001>

<bundles_post_ra>
// kernel: tpu_custom_call.1
= control target key start
LH: loop header
LB: loop body
LE: loop exit
PB: predicated region body
PF: predicated region fallthrough
CT: control target
= control target key end

     0   :  { %10 = vsyncpa [#allocation3], 0  ;;  %s2571_s0 = inlined_call_operand.hbm [shape: f32[1,128,128], index: 0, kind: input, shape index: {}]   ;;  %s2572_s1 = inlined_call_operand.hbm [shape: f32[128,128], index: 1, kind: input, shape index: {}]   ;;  %s2573_s2 = inlined_call_operand.hbm [shape: f32[3,128,128], index: 2, kind: input, shape index: {}]   ;;  %s2574_s3 = inlined_call_operand.vmem [shape: f32[8,128], index: 3, kind: input, shape index: {}]   ;;  %s2575_s4 = inlined_call_operand.hbm [shape: f32[8,128], index: 4, kind: input, shape index: {}]   ;;  %s2576_s5 = inlined_call_operand.hbm [shape: f32[1,8,128], index: 5, kind: output, shape index: {}]  }
   0x1   :  { %11 = vsyncpa [#allocation6], 0 }
   0x2   :  { %12 = vsyncpa [#allocation9], 0 }
   0x3   :  { %13 = vsyncpa [#allocation4], 0  ;;  %s2100_s18 = smov [#allocation5]   ;;  %s2101_s20 = smov [#allocation2]  }
   0x4   :  { %s31_s19 = sshll.u32 %s2100_s18, 4  ;;  %s19_s21 = sshll.u32 %s2101_s20, 4  ;;  %s32_s19 = int_to_ptr.vmem [resolvable:$true] %s31_s19  ;;  %s2140_s21 = int_to_ptr.vmem [resolvable:$true] %s19_s21 }
   0x5   :  { %s1982_s24 = scalar_lea.hbm %s2572_s1, 2048 }
   0x6   :  { %p1983_p0 = scmp.ne.s32.totalorder %s2572_s1, %s1982_s24  ;;  %p1986_p1 = scmp.lt.u32.totalorder %s1982_s24, %s2572_s1 }
   0x8   :  { %p1988_p2 = pnand %p1986_p1, %p1983_p0 }
   0xa   :  { %1991 = shalt.err (!%p1988_p2)
}
   0xb   :  { %s1992_s29 = scalar_lea.vmem %s32_s19, 2048  ;;  %p1997_p4 = scmp.lt.s32.totalorder %s32_s19, %s32_s19 }
   0xc   :  { %p1993_p3 = scmp.ne.s32.totalorder %s32_s19, %s1992_s29  ;;  %p1998_p5 = scmp.lt.s32.totalorder %s1992_s29, %s1992_s29 }
   0xe   :  { %p1999_p6 = por %p1998_p5, %p1997_p4 }
  0x10   :  { %p2000_p7 = pnand %p1999_p6, %p1993_p3 }
  0x12   :  { %2003 = shalt.err (!%p2000_p7)
}
  0x13   :  { %s2102_s30 = smov 128   ;;  %s2103_s6 = smov 8  }
  0x14   :  { %37 = dma.hbm_to_vmem [thread:$0]  %s2572_s1, 2048, %s32_s19, [#allocation6], %s2102_s30, %s2102_s30, %s2103_s6  }
  0x15   :  { %s2004_s11 = scalar_lea.hbm %s2571_s0, 2048 }
  0x16   :  { %p2005_p8 = scmp.ne.s32.totalorder %s2571_s0, %s2004_s11  ;;  %p2008_p9 = scmp.lt.u32.totalorder %s2004_s11, %s2571_s0 }
  0x18   :  { %p2010_p10 = pnand %p2008_p9, %p2005_p8 }
  0x1a   :  { %2013 = shalt.err (!%p2010_p10)
}
  0x1b   :  { %s2014_s16 = scalar_lea.vmem %s2140_s21, 2048  ;;  %p2019_p12 = scmp.lt.s32.totalorder %s2140_s21, %s2140_s21 }
  0x1c   :  { %p2015_p11 = scmp.ne.s32.totalorder %s2140_s21, %s2014_s16  ;;  %p2020_p13 = scmp.lt.s32.totalorder %s2014_s16, %s2014_s16 }
  0x1e   :  { %p2021_p0 = por %p2020_p13, %p2019_p12 }
  0x20   :  { %p2022_p1 = pnand %p2021_p0, %p2015_p11 }
  0x22   :  { %2025 = shalt.err (!%p2022_p1)
}
  0x23   :  { %25 = dma.hbm_to_vmem [thread:$0]  %s2571_s0, 2048, %s2140_s21, [#allocation3], %s2102_s30, %s2102_s30, %s2103_s6  }
  0x24   :  { %s2104_s18 = smov [#allocation7]   ;;  %s2105_s20 = smov [#allocation8]  }
  0x25   :  { %s43_s19 = sshll.u32 %s2104_s18, 4  ;;  %s58_s22 = sshll.u32 %s2105_s20, 4  ;;  %s44_s19 = int_to_ptr.vmem [resolvable:$true] %s43_s19  ;;  %s59_s22 = int_to_ptr.vmem [resolvable:$true] %s58_s22 }
  0x26   :  { %s2026_s25 = scalar_lea.hbm %s2573_s2, 6144 }
  0x27   :  { %p2027_p2 = scmp.ne.s32.totalorder %s2573_s2, %s2026_s25  ;;  %p2030_p3 = scmp.lt.u32.totalorder %s2026_s25, %s2573_s2 }
  0x29   :  { %p2032_p4 = pnand %p2030_p3, %p2027_p2 }
  0x2b   :  { %2035 = shalt.err (!%p2032_p4)
}
  0x2c   :  { %s2036_s0 = scalar_lea.vmem %s44_s19, 6144  ;;  %p2041_p6 = scmp.lt.s32.totalorder %s44_s19, %s44_s19 }
  0x2d   :  { %p2037_p5 = scmp.ne.s32.totalorder %s44_s19, %s2036_s0  ;;  %p2042_p7 = scmp.lt.s32.totalorder %s2036_s0, %s2036_s0 }
  0x2f   :  { %p2043_p8 = por %p2042_p7, %p2041_p6 }
  0x31   :  { %p2044_p9 = pnand %p2043_p8, %p2037_p5 }
  0x33   :  { %2047 = shalt.err (!%p2044_p9)
}
  0x34   :  { %49 = dma.hbm_to_vmem [thread:$0]  %s2573_s2, 6144, %s44_s19, [#allocation6], %s2102_s30, %s2102_s30, %s2103_s6  }
  0x35   :  { %s2048_s10 = scalar_lea.hbm %s2575_s4, 128 }
  0x36   :  { %p2049_p10 = scmp.ne.s32.totalorder %s2575_s4, %s2048_s10  ;;  %p2052_p11 = scmp.lt.u32.totalorder %s2048_s10, %s2575_s4 }
  0x38   :  { %p2054_p12 = pnand %p2052_p11, %p2049_p10 }
  0x3a   :  { %2057 = shalt.err (!%p2054_p12)
}
  0x3b   :  { %s2058_s15 = scalar_lea.vmem %s59_s22, 128  ;;  %p2063_p0 = scmp.lt.s32.totalorder %s59_s22, %s59_s22 }
  0x3c   :  { %p2059_p13 = scmp.ne.s32.totalorder %s59_s22, %s2058_s15  ;;  %p2064_p1 = scmp.lt.s32.totalorder %s2058_s15, %s2058_s15 }
  0x3e   :  { %p2065_p2 = por %p2064_p1, %p2063_p0 }
  0x40   :  { %p2066_p3 = pnand %p2065_p2, %p2059_p13 }
  0x42   :  { %2069 = shalt.err (!%p2066_p3)
}
  0x43   :  { %61 = dma.hbm_to_vmem [thread:$0]  %s2575_s4, 128, %s59_s22, [#allocation9]  }
  0x44   :  { %2092 = dma.done.wait [#allocation3], 2048  }
  0x45   :  { %2093 = vsyncadd [#allocation3], 4294965248 }
  0x46   :  { %2094 = dma.done.wait [#allocation6], 8192  }
  0x47   :  { %2095 = vsyncadd [#allocation6], 4294959104 }
  0x48   :  { %2096 = dma.done.wait [#allocation9], 128  }
  0x49   :  { %2097 = vsyncadd [#allocation9], 4294967168  ;;  %v2204_v0 = vld [vmem:[#allocation2] sm:$0xff]  ;;  %v2206_v1 = vld [vmem:[#allocation2 + $0x8] sm:$0xff]  ;;  %vm2107_vm0 = vmmov 0  }
  0x4a   :  { %v2208_v2 = vld [vmem:[#allocation2 + $0x10] sm:$0xff]  ;;  %v1724_v3 = vpack.c.bf16 %v2206_v1, %v2204_v0  ;;  %v2212_v4 = vld [vmem:[#allocation2 + $0x18] sm:$0xff]  ;;  %v2216_v6 = vld [vmem:[#allocation2 + $0x20] sm:$0xff] }
  0x4b   :  { %v1728_v5 = vpack.c.bf16 %v2212_v4, %v2208_v2  ;;  %v2218_v7 = vld [vmem:[#allocation2 + $0x28] sm:$0xff]  ;;  %v2222_v9 = vld [vmem:[#allocation5] sm:$0xff]  ;;  %v2224_v10 = vld [vmem:[#allocation2 + $0x30] sm:$0xff] }
  0x4c   :  { %1725 = vmatprep.subr.bf16.mxu0 %v1724_v3  ;;  %v1732_v8 = vpack.c.bf16 %v2218_v7, %v2216_v6  ;;  %v2226_v11 = vld [vmem:[#allocation2 + $0x38] sm:$0xff]  ;;  %1441 = vmatprep.mubr.f32.mxu0 %v2222_v9  ;;  %v2231_v13 = vld [vmem:[#allocation2 + $0x40] sm:$0xff]  ;;  %v2233_v14 = vld [vmem:[#allocation2 + $0x48] sm:$0xff] }
  0x4d   :  { %1727 = vmatpush3.bf16.msra.mxu0 %v1724_v3  ;;  %v1736_v12 = vpack.c.bf16 %v2226_v11, %v2224_v10  ;;  %v268_v15 = vld [vmem:[#allocation7 + $0x80] sm:$0xff]  ;;  %v269_v16 = vld [vmem:[#allocation7 + $0x88] sm:$0xff]  ;;  %v270_v17 = vld [vmem:[#allocation7 + $0x90] sm:$0xff]  ;;  %v1740_v21 = vpack.c.bf16 %v2233_v14, %v2231_v13 }
  0x4e   :  { %1729 = vmatprep.subr.bf16.mxu0 %v1728_v5  ;;  %v271_v18 = vld [vmem:[#allocation7 + $0x98] sm:$0xff]  ;;  %v1756_v19 = vpack.c.bf16 %v269_v16, %v268_v15  ;;  %v272_v22 = vld [vmem:[#allocation7 + $0xa0] sm:$0xff]  ;;  %v273_v23 = vld [vmem:[#allocation7 + $0xa8] sm:$0xff] }
  0x4f   :  { %v1760_v20 = vpack.c.bf16 %v271_v18, %v270_v17  ;;  %v2237_v24 = vld [vmem:[#allocation2 + $0x50] sm:$0xff]  ;;  %v2239_v25 = vld [vmem:[#allocation2 + $0x58] sm:$0xff]  ;;  %v1764_v26 = vpack.c.bf16 %v273_v23, %v272_v22  ;;  %v2243_v30 = vld [vmem:[#allocation2 + $0x60] sm:$0xff] }
  0x50   :  { %1757 = vmatprep.subr.bf16.mxu1 %v1756_v19  ;;  %v1744_v27 = vpack.c.bf16 %v2239_v25, %v2237_v24  ;;  %v274_v28 = vld [vmem:[#allocation7 + $0xb0] sm:$0xff]  ;;  %v275_v29 = vld [vmem:[#allocation7 + $0xb8] sm:$0xff]  ;;  %v2245_v31 = vld [vmem:[#allocation2 + $0x68] sm:$0xff] }
  0x51   :  { %1731 = vmatpush3.bf16.msra.mxu0 %v1728_v5  ;;  %1759 = vmatpush3.bf16.msra.mxu1 %v1756_v19  ;;  %v1768_v32 = vpack.c.bf16 %v275_v29, %v274_v28  ;;  %v1748_v33 = vpack.c.bf16 %v2245_v31, %v2243_v30  ;;  %v276_v34 = vld [vmem:[#allocation7 + $0xc0] sm:$0xff]  ;;  %v277_v35 = vld [vmem:[#allocation7 + $0xc8] sm:$0xff]  ;;  %v2249_v36 = vld [vmem:[#allocation2 + $0x70] sm:$0xff] }
  0x52   :  { %1733 = vmatprep.subr.bf16.mxu0 %v1732_v8  ;;  %1761 = vmatprep.subr.bf16.mxu1 %v1760_v20  ;;  %v2251_v37 = vld [vmem:[#allocation2 + $0x78] sm:$0xff]  ;;  %v1772_v38 = vpack.c.bf16 %v277_v35, %v276_v34  ;;  %v278_v40 = vld [vmem:[#allocation7 + $0xd0] sm:$0xff]  ;;  %v280_v43 = vld [vmem:[#allocation7 + $0xe0] sm:$0xff] }
  0x53   :  { %v1752_v39 = vpack.c.bf16 %v2251_v37, %v2249_v36  ;;  %v279_v41 = vld [vmem:[#allocation7 + $0xd8] sm:$0xff]  ;;  %v281_v44 = vld [vmem:[#allocation7 + $0xe8] sm:$0xff]  ;;  %v2257_v47 = vld [vmem:[#allocation5 + $0x10] sm:$0xff] }
  0x54   :  { %v1776_v42 = vpack.c.bf16 %v279_v41, %v278_v40  ;;  %v2255_v45 = vld [vmem:[#allocation5 + $0x8] sm:$0xff]  ;;  %v1780_v46 = vpack.c.bf16 %v281_v44, %v280_v43  ;;  %v282_v48 = vld [vmem:[#allocation7 + $0xf0] sm:$0xff]  ;;  %v283_v49 = vld [vmem:[#allocation7 + $0xf8] sm:$0xff] }
  0x55   :  { %1735 = vmatpush3.bf16.msra.mxu0 %v1732_v8  ;;  %1763 = vmatpush3.bf16.msra.mxu1 %v1760_v20  ;;  %v2261_v50 = vld [vmem:[#allocation5 + $0x18] sm:$0xff]  ;;  %v1784_v51 = vpack.c.bf16 %v283_v49, %v282_v48  ;;  %v2263_v52 = vld [vmem:[#allocation5 + $0x20] sm:$0xff]  ;;  %v2267_v53 = vld [vmem:[#allocation5 + $0x28] sm:$0xff] }
  0x56   :  { %1737 = vmatprep.subr.bf16.mxu0 %v1736_v12  ;;  %1765 = vmatprep.subr.bf16.mxu1 %v1764_v26  ;;  %v2269_v54 = vld [vmem:[#allocation5 + $0x30] sm:$0xff]  ;;  %v2273_v55 = vld [vmem:[#allocation5 + $0x38] sm:$0xff]  ;;  %v2275_v56 = vld [vmem:[#allocation5 + $0x40] sm:$0xff] }
  0x57   :  { %v2279_v57 = vld [vmem:[#allocation5 + $0x48] sm:$0xff]  ;;  %v2281_v58 = vld [vmem:[#allocation5 + $0x50] sm:$0xff]  ;;  %v2285_v59 = vld [vmem:[#allocation5 + $0x58] sm:$0xff] }
  0x58   :  { %v2287_v60 = vld [vmem:[#allocation5 + $0x60] sm:$0xff]  ;;  %v2291_v61 = vld [vmem:[#allocation5 + $0x68] sm:$0xff]  ;;  %v2293_v62 = vld [vmem:[#allocation5 + $0x70] sm:$0xff] }
  0x59   :  { %1739 = vmatpush3.bf16.msra.mxu0 %v1736_v12  ;;  %1767 = vmatpush3.bf16.msra.mxu1 %v1764_v26  ;;  %v2297_v63 = vld [vmem:[#allocation5 + $0x78] sm:$0xff]  ;;  %v90_v3 = vld [vmem:[#allocation7] sm:$0xff]  ;;  %v91_v5 = vld [vmem:[#allocation7 + $0x8] sm:$0xff] }
  0x5a   :  { %1741 = vmatprep.subr.bf16.mxu0 %v1740_v21  ;;  %1769 = vmatprep.subr.bf16.mxu1 %v1768_v32  ;;  %v1788_v8 = vpack.c.bf16 %v91_v5, %v90_v3  ;;  %v92_v12 = vld [vmem:[#allocation7 + $0x10] sm:$0xff]  ;;  %v93_v15 = vld [vmem:[#allocation7 + $0x18] sm:$0xff]  ;;  %v94_v20 = vld [vmem:[#allocation7 + $0x20] sm:$0xff] }
  0x5b   :  { %v1792_v18 = vpack.c.bf16 %v93_v15, %v92_v12  ;;  %v97_v28 = vld [vmem:[#allocation7 + $0x38] sm:$0xff]  ;;  %v98_v35 = vld [vmem:[#allocation7 + $0x40] sm:$0xff]  ;;  %v100_v43 = vld [vmem:[#allocation7 + $0x50] sm:$0xff] }
  0x5c   :  { %v101_v44 = vld [vmem:[#allocation7 + $0x58] sm:$0xff]  ;;  %v102_v3 = vld [vmem:[#allocation7 + $0x60] sm:$0xff]  ;;  %v103_v5 = vld [vmem:[#allocation7 + $0x68] sm:$0xff] }
  0x5d   :  { %1743 = vmatpush3.bf16.msra.mxu0 %v1740_v21  ;;  %1771 = vmatpush3.bf16.msra.mxu1 %v1768_v32  ;;  %v95_v21 = vld [vmem:[#allocation7 + $0x28] sm:$0xff]  ;;  %v1808_v49 = vpack.c.bf16 %v101_v44, %v100_v43  ;;  %v1812_v15 = vpack.c.bf16 %v103_v5, %v102_v3  ;;  %v763_v43 = vld [vmem:[#allocation7 + $0x158] sm:$0xff] }
  0x5e   :  { %1745 = vmatprep.subr.bf16.mxu0 %v1744_v27  ;;  %1773 = vmatprep.subr.bf16.mxu1 %v1772_v38  ;;  %v765_v44 = vld [vmem:[#allocation7 + $0x168] sm:$0xff] }
  0x61   :  { %1747 = vmatpush3.bf16.msra.mxu0 %v1744_v27  ;;  %1775 = vmatpush3.bf16.msra.mxu1 %v1772_v38  ;;  %v96_v27 = vld [vmem:[#allocation7 + $0x30] sm:$0xff]  ;;  %v99_v38 = vld [vmem:[#allocation7 + $0x48] sm:$0xff] }
  0x62   :  { %1749 = vmatprep.subr.bf16.mxu0 %v1748_v33  ;;  %1777 = vmatprep.subr.bf16.mxu1 %v1776_v42  ;;  %v1804_v41 = vpack.c.bf16 %v99_v38, %v98_v35  ;;  %v756_v35 = vld [vmem:[#allocation7 + $0x120] sm:$0xff]  ;;  %v757_v38 = vld [vmem:[#allocation7 + $0x128] sm:$0xff] }
  0x65   :  { %1751 = vmatpush3.bf16.msra.mxu0 %v1748_v33  ;;  %1779 = vmatpush3.bf16.msra.mxu1 %v1776_v42  ;;  %v1800_v33 = vpack.c.bf16 %v97_v28, %v96_v27 }
  0x66   :  { %1753 = vmatprep.subr.bf16.mxu0 %v1752_v39  ;;  %1781 = vmatprep.subr.bf16.mxu1 %v1780_v46 }
  0x69   :  { %1755 = vmatpush3.bf16.msra.mxu0 %v1752_v39  ;;  %1783 = vmatpush3.bf16.msra.mxu1 %v1780_v46 }
  0x6a   :  { %1785 = vmatprep.subr.bf16.mxu1 %v1784_v51 }
  0x6c   :  { %1442 = vmatmul.mubr.f32.vlgmr.msra.gmra.mrb[0].mxu0 %v2255_v45 }
  0x6d   :  { %1444 = vmatprep.mubr.f32.mxu0 %v2257_v47  ;;  %1787 = vmatpush3.bf16.msra.mxu1 %v1784_v51 }
  0x6e   :  { %1789 = vmatprep.subr.bf16.mxu1 %v1788_v8 }
  0x70   :  { %1445 = vmatmul.mubr.f32.gmra.mrb[2].mxu0 %v2261_v50 }
  0x71   :  { %1447 = vmatprep.mubr.f32.mxu0 %v2263_v52 }
  0x74   :  { %1448 = vmatmul.mubr.f32.gmra.mrb[4].mxu0 %v2267_v53 }
  0x75   :  { %1450 = vmatprep.mubr.f32.mxu0 %v2269_v54 }
  0x78   :  { %1451 = vmatmul.mubr.f32.gmra.mrb[6].mxu0 %v2273_v55 }
  0x79   :  { %1453 = vmatprep.mubr.f32.mxu0 %v2275_v56 }
  0x7c   :  { %1454 = vmatmul.mubr.f32.gmra.mrb[8].mxu0 %v2279_v57 }
  0x7d   :  { %1456 = vmatprep.mubr.f32.mxu0 %v2281_v58 }
  0x80   :  { %1457 = vmatmul.mubr.f32.gmra.mrb[10].mxu0 %v2285_v59 }
  0x81   :  { %1459 = vmatprep.mubr.f32.mxu0 %v2287_v60 }
  0x84   :  { %1460 = vmatmul.mubr.f32.gmra.mrb[12].mxu0 %v2291_v61 }
  0x85   :  { %1462 = vmatprep.mubr.f32.mxu0 %v2293_v62 }
  0x88   :  { %1463 = vmatmul.mubr.f32.gmra.mrb[14].mxu0 %v2297_v63 }
  0x89   :  { %1609 = vmatprep.mubr.f32.mxu0 %v2222_v9  ;;  %v1796_v9 = vpack.c.bf16 %v95_v21, %v94_v20 }
 0x13f   :  { %v1443_v16 = vpop.f32.mrb[0].mxu0 }
 0x140   :  { %v188_v17 = vpop.f32.mrb[1].mxu0 }
 0x141   :  { %v1820_v19 = vpack.c.bf16 %v1443_v16, %v188_v17  ;;  %1497 = vmatprep.mubr.f32.mxu1 %v188_v17  ;;  %v104_v17 = vld [vmem:[#allocation7 + $0x70] sm:$0xff] }
 0x142   :  { %1498 = vmatmul.mubr.f32.vlgmr.msra.gmra.mrb[0].mxu1 %v1443_v16 }
 0x143   :  { %v1446_v22 = vpop.f32.mrb[2].mxu0  ;;  %1821 = vmatprep.subr.bf16.mxu0 %v1820_v19  ;;  %1791 = vmatpush3.bf16.msra.mxu1 %v1788_v8 }
 0x144   :  { %v198_v23 = vpop.f32.mrb[3].mxu0  ;;  %1823 = vmatpush3.bf16.msra.mxu0 %v1820_v19  ;;  %1793 = vmatprep.subr.bf16.mxu1 %v1792_v18 }
 0x145   :  { %v1824_v26 = vpack.c.bf16 %v1446_v22, %v198_v23  ;;  %1500 = vmatprep.mubr.f32.mxu1 %v198_v23  ;;  %v752_v23 = vld [vmem:[#allocation7 + $0x100] sm:$0xff] }
 0x146   :  { %1501 = vmatmul.mubr.f32.gmra.mrb[2].mxu1 %v1446_v22 }
 0x147   :  { %v1449_v29 = vpop.f32.mrb[4].mxu0  ;;  %1825 = vmatprep.subr.bf16.mxu0 %v1824_v26  ;;  %1795 = vmatpush3.bf16.msra.mxu1 %v1792_v18  ;;  %v105_v18 = vld [vmem:[#allocation7 + $0x78] sm:$0xff] }
 0x148   :  { %v208_v32 = vpop.f32.mrb[5].mxu0  ;;  %1827 = vmatpush3.bf16.msra.mxu0 %v1824_v26  ;;  %1797 = vmatprep.subr.bf16.mxu1 %v1796_v9  ;;  %v1816_v21 = vpack.c.bf16 %v105_v18, %v104_v17 }
 0x149   :  { %v1828_v34 = vpack.c.bf16 %v1449_v29, %v208_v32  ;;  %1503 = vmatprep.mubr.f32.mxu1 %v208_v32  ;;  %v754_v32 = vld [vmem:[#allocation7 + $0x110] sm:$0xff] }
 0x14a   :  { %1504 = vmatmul.mubr.f32.gmra.mrb[4].mxu1 %v1449_v29 }
 0x14b   :  { %v1452_v39 = vpop.f32.mrb[6].mxu0  ;;  %1829 = vmatprep.subr.bf16.mxu0 %v1828_v34  ;;  %1799 = vmatpush3.bf16.msra.mxu1 %v1796_v9  ;;  %v753_v9 = vld [vmem:[#allocation7 + $0x108] sm:$0xff] }
 0x14c   :  { %v218_v40 = vpop.f32.mrb[7].mxu0  ;;  %1831 = vmatpush3.bf16.msra.mxu0 %v1828_v34  ;;  %1801 = vmatprep.subr.bf16.mxu1 %v1800_v33  ;;  %v1852_v29 = vpack.c.bf16 %v753_v9, %v752_v23 }
 0x14d   :  { %v1832_v42 = vpack.c.bf16 %v1452_v39, %v218_v40  ;;  %1506 = vmatprep.mubr.f32.mxu1 %v218_v40  ;;  %v758_v40 = vld [vmem:[#allocation7 + $0x130] sm:$0xff] }
 0x14e   :  { %1507 = vmatmul.mubr.f32.gmra.mrb[6].mxu1 %v1452_v39  ;;  %v1860_v39 = vpack.c.bf16 %v757_v38, %v756_v35 }
 0x14f   :  { %v1455_v46 = vpop.f32.mrb[8].mxu0  ;;  %1833 = vmatprep.subr.bf16.mxu0 %v1832_v42  ;;  %1803 = vmatpush3.bf16.msra.mxu1 %v1800_v33  ;;  %v755_v33 = vld [vmem:[#allocation7 + $0x118] sm:$0xff] }
 0x150   :  { %v228_v48 = vpop.f32.mrb[9].mxu0  ;;  %1835 = vmatpush3.bf16.msra.mxu0 %v1832_v42  ;;  %1805 = vmatprep.subr.bf16.mxu1 %v1804_v41  ;;  %v1856_v34 = vpack.c.bf16 %v755_v33, %v754_v32  ;;  %v761_v42 = vld [vmem:[#allocation7 + $0x148] sm:$0xff] }
 0x151   :  { %v1836_v51 = vpack.c.bf16 %v1455_v46, %v228_v48  ;;  %1509 = vmatprep.mubr.f32.mxu1 %v228_v48 }
 0x152   :  { %1510 = vmatmul.mubr.f32.gmra.mrb[8].mxu1 %v1455_v46 }
 0x153   :  { %v1458_v8 = vpop.f32.mrb[10].mxu0  ;;  %1837 = vmatprep.subr.bf16.mxu0 %v1836_v51  ;;  %1807 = vmatpush3.bf16.msra.mxu1 %v1804_v41  ;;  %v759_v41 = vld [vmem:[#allocation7 + $0x138] sm:$0xff] }
 0x154   :  { %v238_v12 = vpop.f32.mrb[11].mxu0  ;;  %1839 = vmatpush3.bf16.msra.mxu0 %v1836_v51  ;;  %1809 = vmatprep.subr.bf16.mxu1 %v1808_v49 }
 0x155   :  { %v1840_v16 = vpack.c.bf16 %v1458_v8, %v238_v12  ;;  %1512 = vmatprep.mubr.f32.mxu1 %v238_v12 }
 0x156   :  { %1513 = vmatmul.mubr.f32.gmra.mrb[10].mxu1 %v1458_v8 }
 0x157   :  { %v1461_v19 = vpop.f32.mrb[12].mxu0  ;;  %1841 = vmatprep.subr.bf16.mxu0 %v1840_v16  ;;  %1811 = vmatpush3.bf16.msra.mxu1 %v1808_v49 }
 0x158   :  { %v248_v20 = vpop.f32.mrb[13].mxu0  ;;  %1843 = vmatpush3.bf16.msra.mxu0 %v1840_v16  ;;  %1813 = vmatprep.subr.bf16.mxu1 %v1812_v15 }
 0x159   :  { %v1844_v22 = vpack.c.bf16 %v1461_v19, %v248_v20  ;;  %1515 = vmatprep.mubr.f32.mxu1 %v248_v20 }
 0x15a   :  { %1516 = vmatmul.mubr.f32.gmra.mrb[12].mxu1 %v1461_v19 }
 0x15b   :  { %v1464_v26 = vpop.f32.mrb[14].mxu0  ;;  %1845 = vmatprep.subr.bf16.mxu0 %v1844_v22  ;;  %1815 = vmatpush3.bf16.msra.mxu1 %v1812_v15 }
 0x15c   :  { %v258_v27 = vpop.f32.mrb[15].mxu0  ;;  %1847 = vmatpush3.bf16.msra.mxu0 %v1844_v22  ;;  %1817 = vmatprep.subr.bf16.mxu1 %v1816_v21 }
 0x15d   :  { %v1848_v28 = vpack.c.bf16 %v1464_v26, %v258_v27  ;;  %1518 = vmatprep.mubr.f32.mxu1 %v258_v27 }
 0x15e   :  { %1519 = vmatmul.mubr.f32.gmra.mrb[14].mxu1 %v1464_v26 }
 0x15f   :  { %1849 = vmatprep.subr.bf16.mxu0 %v1848_v28  ;;  %1819 = vmatpush3.bf16.msra.mxu1 %v1816_v21 }
 0x160   :  { %1851 = vmatpush3.bf16.msra.mxu0 %v1848_v28  ;;  %1553 = vmatprep.mubr.f32.mxu1 %v2204_v0 }
 0x161   :  { %1853 = vmatprep.subr.bf16.mxu1 %v1852_v29 }
 0x162   :  { %1554 = vmatmul.mubr.f32.vlgmr.msra.gmra.mrb[0].mxu1 %v2206_v1 }
 0x163   :  { %1610 = vmatmul.mubr.f32.vlgmr.msra.gmra.mrb[16].mxu0 %v2255_v45  ;;  %1855 = vmatpush3.bf16.msra.mxu1 %v1852_v29  ;;  %v1864_v45 = vpack.c.bf16 %v759_v41, %v758_v40 }
 0x164   :  { %1612 = vmatprep.mubr.f32.mxu0 %v2257_v47  ;;  %1556 = vmatprep.mubr.f32.mxu1 %v2208_v2  ;;  %v760_v47 = vld [vmem:[#allocation7 + $0x140] sm:$0xff] }
 0x165   :  { %1857 = vmatprep.subr.bf16.mxu1 %v1856_v34 }
 0x166   :  { %1557 = vmatmul.mubr.f32.gmra.mrb[2].mxu1 %v2212_v4 }
 0x167   :  { %1613 = vmatmul.mubr.f32.gmra.mrb[18].mxu0 %v2261_v50  ;;  %1859 = vmatpush3.bf16.msra.mxu1 %v1856_v34  ;;  %v1868_v50 = vpack.c.bf16 %v761_v42, %v760_v47  ;;  %v2108_v42 = vmov 0.0  }
 0x168   :  { %1615 = vmatprep.mubr.f32.mxu0 %v2263_v52  ;;  %1559 = vmatprep.mubr.f32.mxu1 %v2216_v6  ;;  %v762_v52 = vld [vmem:[#allocation7 + $0x150] sm:$0xff] }
 0x169   :  { %1861 = vmatprep.subr.bf16.mxu1 %v1860_v39 }
 0x16a   :  { %1560 = vmatmul.mubr.f32.gmra.mrb[4].mxu1 %v2218_v7 }
 0x16b   :  { %1616 = vmatmul.mubr.f32.gmra.mrb[20].mxu0 %v2267_v53  ;;  %1863 = vmatpush3.bf16.msra.mxu1 %v1860_v39  ;;  %v1872_v53 = vpack.c.bf16 %v763_v43, %v762_v52 }
 0x16c   :  { %1618 = vmatprep.mubr.f32.mxu0 %v2269_v54  ;;  %1562 = vmatprep.mubr.f32.mxu1 %v2224_v10  ;;  %v764_v54 = vld [vmem:[#allocation7 + $0x160] sm:$0xff] }
 0x16d   :  { %1865 = vmatprep.subr.bf16.mxu1 %v1864_v45 }
 0x16e   :  { %1563 = vmatmul.mubr.f32.gmra.mrb[6].mxu1 %v2226_v11 }
 0x16f   :  { %1619 = vmatmul.mubr.f32.gmra.mrb[22].mxu0 %v2273_v55  ;;  %1867 = vmatpush3.bf16.msra.mxu1 %v1864_v45  ;;  %v1876_v55 = vpack.c.bf16 %v765_v44, %v764_v54 }
 0x170   :  { %1621 = vmatprep.mubr.f32.mxu0 %v2275_v56  ;;  %1565 = vmatprep.mubr.f32.mxu1 %v2231_v13  ;;  %v766_v56 = vld [vmem:[#allocation7 + $0x170] sm:$0xff] }
 0x171   :  { %1869 = vmatprep.subr.bf16.mxu1 %v1868_v50 }
 0x172   :  { %1566 = vmatmul.mubr.f32.gmra.mrb[8].mxu1 %v2233_v14 }
 0x173   :  { %1622 = vmatmul.mubr.f32.gmra.mrb[24].mxu0 %v2279_v57  ;;  %1871 = vmatpush3.bf16.msra.mxu1 %v1868_v50  ;;  %v767_v57 = vld [vmem:[#allocation7 + $0x178] sm:$0xff] }
 0x174   :  { %1624 = vmatprep.mubr.f32.mxu0 %v2281_v58  ;;  %1568 = vmatprep.mubr.f32.mxu1 %v2237_v24  ;;  %v1880_v58 = vpack.c.bf16 %v767_v57, %v766_v56 }
 0x175   :  { %1873 = vmatprep.subr.bf16.mxu1 %v1872_v53 }
 0x176   :  { %1569 = vmatmul.mubr.f32.gmra.mrb[10].mxu1 %v2239_v25 }
 0x177   :  { %1625 = vmatmul.mubr.f32.gmra.mrb[26].mxu0 %v2285_v59  ;;  %1875 = vmatpush3.bf16.msra.mxu1 %v1872_v53 }
 0x178   :  { %1627 = vmatprep.mubr.f32.mxu0 %v2287_v60  ;;  %1571 = vmatprep.mubr.f32.mxu1 %v2243_v30 }
 0x179   :  { %1877 = vmatprep.subr.bf16.mxu1 %v1876_v55 }
 0x17a   :  { %1572 = vmatmul.mubr.f32.gmra.mrb[12].mxu1 %v2245_v31 }
 0x17b   :  { %1628 = vmatmul.mubr.f32.gmra.mrb[28].mxu0 %v2291_v61  ;;  %1879 = vmatpush3.bf16.msra.mxu1 %v1876_v55 }
 0x17c   :  { %1630 = vmatprep.mubr.f32.mxu0 %v2293_v62  ;;  %1574 = vmatprep.mubr.f32.mxu1 %v2249_v36 }
 0x17d   :  { %1881 = vmatprep.subr.bf16.mxu1 %v1880_v58 }
 0x17e   :  { %1575 = vmatmul.mubr.f32.gmra.mrb[14].mxu1 %v2251_v37 }
 0x17f   :  { %1631 = vmatmul.mubr.f32.gmra.mrb[30].mxu0 %v2297_v63  ;;  %1883 = vmatpush3.bf16.msra.mxu1 %v1880_v58 }
 0x180   :  { %1721 = vmatprep.mubr.msk.f32.mxu0 %vm2107_vm0, %v2108_v42 }
 0x236   :  { %v1611_v59 = vpop.f32.mrb[16].mxu0 }
 0x237   :  { %v720_v60 = vmul.f32 2.0, %v1611_v59  ;;  %v640_v46 = vpop.f32.mrb[17].mxu0 }
 0x238   :  { %v719_v48 = vmul.f32 2.0, %v640_v46 }
 0x239   :  { %v736_v62 = vsub.f32 %v720_v60, %v2206_v1 }
 0x23a   :  { %v735_v61 = vsub.f32 %v719_v48, %v2204_v0  ;;  %v1614_v49 = vpop.f32.mrb[18].mxu0 }
 0x23b   :  { %v722_v51 = vmul.f32 2.0, %v1614_v49  ;;  %v650_v3 = vpop.f32.mrb[19].mxu0 }
 0x23c   :  { %v721_v5 = vmul.f32 2.0, %v650_v3  ;;  %1665 = vmatprep.mubr.f32.mxu1 %v735_v61 }
 0x23d   :  { %1666 = vmatmul.mubr.f32.vlgmr.msra.gmra.mrb[0].mxu1 %v736_v62  ;;  %v738_v12 = vsub.f32 %v722_v51, %v2212_v4 }
 0x23e   :  { %v737_v63 = vsub.f32 %v721_v5, %v2208_v2  ;;  %v1617_v8 = vpop.f32.mrb[20].mxu0 }
 0x23f   :  { %v724_v15 = vmul.f32 2.0, %v1617_v8  ;;  %v660_v16 = vpop.f32.mrb[21].mxu0 }
 0x240   :  { %v723_v17 = vmul.f32 2.0, %v660_v16  ;;  %1668 = vmatprep.mubr.f32.mxu1 %v737_v63 }
 0x241   :  { %1669 = vmatmul.mubr.f32.gmra.mrb[2].mxu1 %v738_v12  ;;  %v740_v1 = vsub.f32 %v724_v15, %v2218_v7 }
 0x242   :  { %v739_v0 = vsub.f32 %v723_v17, %v2216_v6  ;;  %v1620_v18 = vpop.f32.mrb[22].mxu0 }
 0x243   :  { %v726_v19 = vmul.f32 2.0, %v1620_v18  ;;  %v670_v20 = vpop.f32.mrb[23].mxu0 }
 0x244   :  { %v725_v21 = vmul.f32 2.0, %v670_v20  ;;  %1671 = vmatprep.mubr.f32.mxu1 %v739_v0 }
 0x245   :  { %1672 = vmatmul.mubr.f32.gmra.mrb[4].mxu1 %v740_v1  ;;  %v742_v4 = vsub.f32 %v726_v19, %v2226_v11 }
 0x246   :  { %v741_v2 = vsub.f32 %v725_v21, %v2224_v10  ;;  %v1623_v22 = vpop.f32.mrb[24].mxu0 }
 0x247   :  { %v728_v23 = vmul.f32 2.0, %v1623_v22  ;;  %v680_v9 = vpop.f32.mrb[25].mxu0 }
 0x248   :  { %v727_v26 = vmul.f32 2.0, %v680_v9  ;;  %1674 = vmatprep.mubr.f32.mxu1 %v741_v2 }
 0x249   :  { %1675 = vmatmul.mubr.f32.gmra.mrb[6].mxu1 %v742_v4  ;;  %v744_v7 = vsub.f32 %v728_v23, %v2233_v14 }
 0x24a   :  { %v743_v6 = vsub.f32 %v727_v26, %v2231_v13  ;;  %v1626_v27 = vpop.f32.mrb[26].mxu0 }
 0x24b   :  { %v730_v28 = vmul.f32 2.0, %v1626_v27  ;;  %v690_v29 = vpop.f32.mrb[27].mxu0 }
 0x24c   :  { %v729_v32 = vmul.f32 2.0, %v690_v29  ;;  %1677 = vmatprep.mubr.f32.mxu1 %v743_v6 }
 0x24d   :  { %1678 = vmatmul.mubr.f32.gmra.mrb[8].mxu1 %v744_v7  ;;  %v746_v11 = vsub.f32 %v730_v28, %v2239_v25  ;;  %v2106_v25 = vmov 0.0|0.0  }
 0x24e   :  { %v745_v10 = vsub.f32 %v729_v32, %v2237_v24  ;;  %v1629_v33 = vpop.f32.mrb[28].mxu0  ;;  %1884 = vmatprep.subr.bf16.mxu0 %v2106_v25 }
 0x24f   :  { %v732_v34 = vmul.f32 2.0, %v1629_v33  ;;  %v700_v35 = vpop.f32.mrb[29].mxu0 }
 0x250   :  { %v731_v38 = vmul.f32 2.0, %v700_v35  ;;  %1680 = vmatprep.mubr.f32.mxu1 %v745_v10 }
 0x251   :  { %1681 = vmatmul.mubr.f32.gmra.mrb[10].mxu1 %v746_v11  ;;  %v748_v14 = vsub.f32 %v732_v34, %v2245_v31 }
 0x252   :  { %v747_v13 = vsub.f32 %v731_v38, %v2243_v30  ;;  %v1632_v39 = vpop.f32.mrb[30].mxu0  ;;  %v2352_v30 = vld [vmem:[%s2574_s3] ss:$0 sm:$0xff]  ;;  %s2109_s3 = smov [#allocation10]  }
 0x253   :  { %v734_v40 = vmul.f32 2.0, %v1632_v39  ;;  %v710_v41 = vpop.f32.mrb[31].mxu0  ;;  %s1204_s16 = sshll.u32 %s2109_s3, 4  ;;  %s1205_s16 = int_to_ptr.vmem [resolvable:$true] %s1204_s16 }
 0x254   :  { %v733_v45 = vmul.f32 2.0, %v710_v41  ;;  %1683 = vmatprep.mubr.f32.mxu1 %v747_v13  ;;  %s2070_s1 = scalar_lea.vmem %s1205_s16, 128  ;;  %p2075_p5 = scmp.lt.s32.totalorder %s1205_s16, %s1205_s16 }
 0x255   :  { %1684 = vmatmul.mubr.f32.gmra.mrb[12].mxu1 %v748_v14  ;;  %v750_v47 = vsub.f32 %v734_v40, %v2251_v37  ;;  %p2071_p4 = scmp.ne.s32.totalorder %s1205_s16, %s2070_s1  ;;  %p2076_p6 = scmp.lt.s32.totalorder %s2070_s1, %s2070_s1 }
 0x256   :  { %v749_v24 = vsub.f32 %v733_v45, %v2249_v36 }
 0x257   :  { %p2077_p7 = por %p2076_p6, %p2075_p5 }
 0x258   :  { %1686 = vmatprep.mubr.f32.mxu1 %v749_v24 }
 0x259   :  { %1687 = vmatmul.mubr.f32.gmra.mrb[14].mxu1 %v750_v47  ;;  %p2078_p8 = pnand %p2077_p7, %p2071_p4 }
 0x310   :  { %v1667_v31 = vpop.f32.mrb[0].mxu1 }
 0x311   :  { %v2355_v50 = vadd.f32 %v1667_v31, %v2352_v30  ;;  %v834_v36 = vpop.f32.mrb[1].mxu1 }
 0x312   :  { %v2358_v37 = vadd.f32 %v2352_v30, %v834_v36 }
 0x313   :  { %v951_v52 = vmin.f32 %v2355_v50, 0.0  ;;  %vm1095_vm1 = vcmp.gt.f32.partialorder %v2355_v50, 0.0 }
 0x314   :  { %v2362_v43 = vmin.f32 %v2358_v37, 0.0  ;;  %v1670_v53 = vpop.f32.mrb[2].mxu1  ;;  %vm1094_vm4 = vcmp.gt.f32.partialorder %v2358_v37, 0.0 }
 0x315   :  { %v1032_v54 = vmul.f32 1.442695, %v951_v52  ;;  %v2365_v44 = vadd.f32 %v1670_v53, %v2352_v30  ;;  %v844_v55 = vpop.f32.mrb[3].mxu1  ;;  %v983_v46 = vmul.f32 0.5, %v951_v52  ;;  %vm967_vm2 = vcmp.gt.f32.partialorder %v951_v52, -0.001 }
 0x316   :  { %v1030_v56 = vmul.f32 1.442695, %v2362_v43  ;;  %v2369_v57 = vadd.f32 %v2352_v30, %v844_v55  ;;  %v982_v62 = vmul.f32 0.5, %v2362_v43  ;;  %vm966_vm3 = vcmp.gt.f32.partialorder %v2362_v43, -0.001 }
 0x317   :  { %1950 = vpow2.f32 %v1032_v54  ;;  %v2372_v58 = vmin.f32 %v2365_v44, 0.0  ;;  %v999_v8 = vadd.f32 1.0, %v983_v46  ;;  %vm1097_vm5 = vcmp.gt.f32.partialorder %v2365_v44, 0.0 }
 0x318   :  { %1952 = vpow2.f32 %v1030_v56  ;;  %v2375_v59 = vmin.f32 %v2369_v57, 0.0  ;;  %v1673_v60 = vpop.f32.mrb[4].mxu1  ;;  %v998_v1 = vadd.f32 1.0, %v982_v62  ;;  %vm1096_vm6 = vcmp.gt.f32.partialorder %v2369_v57, 0.0 }
 0x319   :  { %v1036_v48 = vmul.f32 1.442695, %v2372_v58  ;;  %v854_v61 = vpop.f32.mrb[5].mxu1  ;;  %v2381_v51 = vadd.f32 %v1673_v60, %v2352_v30  ;;  %v985_v5 = vmul.f32 0.5, %v2372_v58  ;;  %v1015_v4 = vmul.f32 %v999_v8, %v951_v52 }
 0x31a   :  { %v1034_v49 = vmul.f32 1.442695, %v2375_v59  ;;  %v2384_v3 = vadd.f32 %v2352_v30, %v854_v61  ;;  %v984_v17 = vmul.f32 0.5, %v2375_v59  ;;  %v1014_v29 = vmul.f32 %v998_v1, %v2362_v43 }
 0x31b   :  { %1954 = vpow2.f32 %v1036_v48  ;;  %v2389_v12 = vmin.f32 %v2381_v51, 0.0  ;;  %v1001_v20 = vadd.f32 1.0, %v985_v5  ;;  %vm969_vm7 = vcmp.gt.f32.partialorder %v2372_v58, -0.001 }
 0x31c   :  { %1956 = vpow2.f32 %v1034_v49  ;;  %v1676_v63 = vpop.f32.mrb[6].mxu1  ;;  %v2392_v15 = vmin.f32 %v2384_v3, 0.0  ;;  %v1000_v27 = vadd.f32 1.0, %v984_v17  ;;  %vm968_vm8 = vcmp.gt.f32.partialorder %v2375_v59, -0.001 }
 0x31d   :  { %v864_v16 = vpop.f32.mrb[7].mxu1  ;;  %v2396_v0 = vadd.f32 %v1676_v63, %v2352_v30  ;;  %v1040_v19 = vmul.f32 1.442695, %v2389_v12  ;;  %v987_v7 = vmul.f32 0.5, %v2389_v12  ;;  %v1017_v34 = vmul.f32 %v1001_v20, %v2372_v58 }
 0x31e   :  { %v2399_v18 = vadd.f32 %v2352_v30, %v864_v16  ;;  %v1038_v21 = vmul.f32 1.442695, %v2392_v15  ;;  %v986_v10 = vmul.f32 0.5, %v2392_v15  ;;  %v1016_v47 = vmul.f32 %v1000_v27, %v2375_v59 }
 0x31f   :  { %v2407_v2 = vmin.f32 %v2396_v0, 0.0  ;;  %1958 = vpow2.f32 %v1040_v19  ;;  %v1003_v42 = vadd.f32 1.0, %v987_v7  ;;  %vm1099_vm9 = vcmp.gt.f32.partialorder %v2381_v51, 0.0 }
 0x320   :  { %v2411_v23 = vmin.f32 %v2399_v18, 0.0  ;;  %v1679_v9 = vpop.f32.mrb[8].mxu1  ;;  %1960 = vpow2.f32 %v1038_v21  ;;  %v1002_v52 = vadd.f32 1.0, %v986_v10  ;;  %vm971_vm10 = vcmp.gt.f32.partialorder %v2389_v12, -0.001 }
 0x321   :  { %v1951_v22 = vpop.eup %1950  ;;  %v874_v28 = vpop.f32.mrb[9].mxu1  ;;  %v1044_v33 = vmul.f32 1.442695, %v2407_v2  ;;  %v989_v43 = vmul.f32 0.5, %v2407_v2  ;;  %v2435_v53 = vadd.f32 %v1679_v9, %v2352_v30  ;;  %v1019_v62 = vmul.f32 %v1003_v42, %v2389_v12 }
 0x322   :  { %v1953_v26 = vpop.eup %1952  ;;  %v1217_v6 = vadd.f32 -1.0, %v1951_v22  ;;  %v1042_v14 = vmul.f32 1.442695, %v2411_v23  ;;  %v2438_v54 = vadd.f32 %v2352_v30, %v874_v28  ;;  %v988_v48 = vmul.f32 0.5, %v2411_v23 }
 0x323   :  { %v1216_v32 = vadd.f32 -1.0, %v1953_v26  ;;  %1962 = vpow2.f32 %v1044_v33  ;;  %v2454_v61 = vmin.f32 %v2435_v53, 0.0  ;;  %vm1098_vm11 = vcmp.gt.f32.partialorder %v2384_v3, 0.0 }
 0x324   :  { %v1079_v11 = vsel %vm967_vm2, %v1015_v4, %v1217_v6  ;;  %v1682_v35 = vpop.f32.mrb[10].mxu1  ;;  %1964 = vpow2.f32 %v1042_v14  ;;  %v1018_v63 = vmul.f32 %v1002_v52, %v2392_v15  ;;  %v1005_v8 = vadd.f32 1.0, %v989_v43 }
 0x325   :  { %v1955_v38 = vpop.eup %1954  ;;  %v1111_v13 = vsel %vm1095_vm1, %v2355_v50, %v1079_v11  ;;  %v1078_v39 = vsel %vm966_vm3, %v1014_v29, %v1216_v32  ;;  %v884_v40 = vpop.f32.mrb[11].mxu1  ;;  %v2447_v58 = vadd.f32 %v1682_v35, %v2352_v30  ;;  %v1048_v16 = vmul.f32 1.442695, %v2454_v61 }
 0x326   :  { %v1957_v41 = vpop.eup %1956  ;;  %v1110_v45 = vsel %vm1094_vm4, %v2358_v37, %v1078_v39  ;;  %v1219_v24 = vadd.f32 -1.0, %v1955_v38  ;;  %v2470_v20 = vadd.f32 %v2352_v30, %v884_v40  ;;  %vm970_vm12 = vcmp.gt.f32.partialorder %v2392_v15, -0.001 }
 0x327   :  { %v1885_v31 = vpack.c.bf16 %v1111_v13, %v1110_v45  ;;  %v1218_v36 = vadd.f32 -1.0, %v1957_v41  ;;  %v2467_v19 = vmin.f32 %v2447_v58, 0.0  ;;  %v1004_v21 = vadd.f32 1.0, %v988_v48 }
 0x328   :  { %v1081_v50 = vsel %vm969_vm7, %v1017_v34, %v1219_v24  ;;  %v1685_v37 = vpop.f32.mrb[12].mxu1  ;;  %1966 = vpow2.f32 %v1048_v16  ;;  %vm1101_vm13 = vcmp.gt.f32.partialorder %v2396_v0, 0.0  ;;  %vm973_vm14 = vcmp.gt.f32.partialorder %v2407_v2, -0.001 }
 0x329   :  { %v1113_v55 = vsel %vm1097_vm5, %v2365_v44, %v1081_v50  ;;  %v1080_v56 = vsel %vm968_vm8, %v1016_v47, %v1218_v36  ;;  %v894_v60 = vpop.f32.mrb[13].mxu1  ;;  %1886 = vmatpush3.bf16.msra.mxu0 %v1885_v31  ;;  %v2457_v44 = vmin.f32 %v2438_v54, 0.0  ;;  %v1959_v59 = vpop.eup %1958  ;;  %v1021_v15 = vmul.f32 %v1005_v8, %v2407_v2 }
 0x32a   :  { %v1112_v46 = vsel %vm1096_vm6, %v2369_v57, %v1080_v56  ;;  %1887 = vmatprep.subr.bf16.mxu0 %v2106_v25  ;;  %v1961_v5 = vpop.eup %1960  ;;  %v1221_v57 = vadd.f32 -1.0, %v1959_v59  ;;  %v991_v32 = vmul.f32 0.5, %v2454_v61  ;;  %v2486_v10 = vmin.f32 %v2470_v20, 0.0 }
 0x32b   :  { %v1888_v49 = vpack.c.bf16 %v1113_v55, %v1112_v46  ;;  %v1220_v17 = vadd.f32 -1.0, %v1961_v5  ;;  %v1046_v1 = vmul.f32 1.442695, %v2457_v44  ;;  %v1020_v11 = vmul.f32 %v1004_v21, %v2411_v23 }
 0x32c   :  { %v1083_v12 = vsel %vm971_vm10, %v1019_v62, %v1221_v57  ;;  %v1688_v22 = vpop.f32.mrb[14].mxu1  ;;  %vm972_vm15 = vcmp.gt.f32.partialorder %v2411_v23, -0.001  ;;  %vm1100_vm0 = vcmp.gt.f32.partialorder %v2399_v18, 0.0  ;;  %v993_v38 = vmul.f32 0.5, %v2467_v19 }
 0x32d   :  { %1889 = vmatpush3.bf16.msra.mxu0 %v1888_v49  ;;  %v1963_v4 = vpop.eup %1962  ;;  %v1115_v9 = vsel %vm1099_vm9, %v2381_v51, %v1083_v12  ;;  %v1082_v26 = vsel %vm970_vm12, %v1018_v63, %v1220_v17  ;;  %1968 = vpow2.f32 %v1046_v1  ;;  %v904_v6 = vpop.f32.mrb[15].mxu1  ;;  %v1052_v51 = vmul.f32 1.442695, %v2467_v19 }
 0x32e   :  { %1890 = vmatprep.subr.bf16.mxu0 %v2106_v25  ;;  %v1114_v27 = vsel %vm1098_vm11, %v2384_v3, %v1082_v26  ;;  %v1223_v7 = vadd.f32 -1.0, %v1963_v4  ;;  %v1965_v28 = vpop.eup %1964  ;;  %v990_v3 = vmul.f32 0.5, %v2457_v44  ;;  %v1050_v13 = vmul.f32 1.442695, %v2486_v10 }
 0x32f   :  { %v1891_v29 = vpack.c.bf16 %v1115_v9, %v1114_v27  ;;  %v1222_v34 = vadd.f32 -1.0, %v1965_v28  ;;  %1970 = vpow2.f32 %v1052_v51  ;;  %v2498_v39 = vadd.f32 %v1685_v37, %v2352_v30 }
 0x330   :  { %v1085_v33 = vsel %vm973_vm14, %v1021_v15, %v1223_v7  ;;  %v1007_v40 = vadd.f32 1.0, %v991_v32  ;;  %v2506_v23 = vadd.f32 %v1688_v22, %v2352_v30  ;;  %v1006_v45 = vadd.f32 1.0, %v990_v3 }
 0x331   :  { %v1117_v2 = vsel %vm1101_vm13, %v2396_v0, %v1085_v33  ;;  %1892 = vmatpush3.bf16.msra.mxu0 %v1891_v29  ;;  %v1084_v35 = vsel %vm972_vm15, %v1020_v11, %v1222_v34  ;;  %v2503_v0 = vadd.f32 %v2352_v30, %v894_v60  ;;  %1972 = vpow2.f32 %v1050_v13 }
 0x332   :  { %1893 = vmatprep.subr.bf16.mxu0 %v2106_v25  ;;  %v1116_v14 = vsel %vm1100_vm0, %v2399_v18, %v1084_v35  ;;  %v2509_v24 = vmin.f32 %v2498_v39, 0.0  ;;  %v1967_v42 = vpop.eup %1966  ;;  %vm1103_vm1 = vcmp.gt.f32.partialorder %v2435_v53, 0.0  ;;  %v1009_v18 = vadd.f32 1.0, %v993_v38 }
 0x333   :  { %v1894_v41 = vpack.c.bf16 %v1117_v2, %v1116_v14  ;;  %v2512_v47 = vmin.f32 %v2503_v0, 0.0  ;;  %v2517_v36 = vmin.f32 %v2506_v23, 0.0  ;;  %v1023_v50 = vmul.f32 %v1007_v40, %v2454_v61 }
 0x334   :  { %v1056_v31 = vmul.f32 1.442695, %v2509_v24  ;;  %v1225_v43 = vadd.f32 -1.0, %v1967_v42  ;;  %v992_v37 = vmul.f32 0.5, %v2486_v10  ;;  %vm975_vm2 = vcmp.gt.f32.partialorder %v2454_v61, -0.001 }
 0x335   :  { %1895 = vmatpush3.bf16.msra.mxu0 %v1894_v41  ;;  %v1054_v55 = vmul.f32 1.442695, %v2512_v47  ;;  %v1022_v56 = vmul.f32 %v1006_v45, %v2457_v44  ;;  %vm974_vm3 = vcmp.gt.f32.partialorder %v2457_v44, -0.001  ;;  %vm1102_vm4 = vcmp.gt.f32.partialorder %v2438_v54, 0.0  ;;  %v1126_v42 = vld [vmem:[#allocation8] sm:$0xff] }
 0x336   :  { %1896 = vmatprep.subr.bf16.mxu0 %v2106_v25  ;;  %1974 = vpow2.f32 %v1056_v31  ;;  %v1087_v46 = vsel %vm975_vm2, %v1023_v50, %v1225_v43  ;;  %v1025_v49 = vmul.f32 %v1009_v18, %v2467_v19  ;;  %v1060_v62 = vmul.f32 1.442695, %v2517_v36 }
 0x337   :  { %v1969_v52 = vpop.eup %1968  ;;  %1976 = vpow2.f32 %v1054_v55  ;;  %v1119_v48 = vsel %vm1103_vm1, %v2435_v53, %v1087_v46  ;;  %v1008_v57 = vadd.f32 1.0, %v992_v37  ;;  %v995_v63 = vmul.f32 0.5, %v2509_v24 }
 0x338   :  { %v1224_v60 = vadd.f32 -1.0, %v1969_v52  ;;  %v948_v44 = vadd.f32 %v2352_v30, %v904_v6  ;;  %v994_v17 = vmul.f32 0.5, %v2512_v47  ;;  %1978 = vpow2.f32 %v1060_v62 }
 0x339   :  { %v1971_v61 = vpop.eup %1970  ;;  %vm977_vm5 = vcmp.gt.f32.partialorder %v2467_v19, -0.001  ;;  %vm1105_vm6 = vcmp.gt.f32.partialorder %v2447_v58, 0.0  ;;  %v1011_v22 = vadd.f32 1.0, %v995_v63  ;;  %vm976_vm7 = vcmp.gt.f32.partialorder %v2486_v10, -0.001 }
 0x33a   :  { %v1086_v59 = vsel %vm974_vm3, %v1022_v56, %v1224_v60  ;;  %v1227_v16 = vadd.f32 -1.0, %v1971_v61  ;;  %v964_v53 = vmin.f32 %v948_v44, 0.0  ;;  %v1010_v4 = vadd.f32 1.0, %v994_v17 }
 0x33b   :  { %v1118_v5 = vsel %vm1102_vm4, %v2438_v54, %v1086_v59  ;;  %v1973_v1 = vpop.eup %1972  ;;  %v1024_v54 = vmul.f32 %v1008_v57, %v2486_v10  ;;  %vm1104_vm8 = vcmp.gt.f32.partialorder %v2470_v20, 0.0  ;;  %v997_v19 = vmul.f32 0.5, %v2517_v36 }
 0x33c   :  { %v1897_v8 = vpack.c.bf16 %v1119_v48, %v1118_v5  ;;  %v1089_v12 = vsel %vm977_vm5, %v1025_v49, %v1227_v16  ;;  %v1226_v21 = vadd.f32 -1.0, %v1973_v1  ;;  %v1058_v9 = vmul.f32 1.442695, %v964_v53 }
 0x33d   :  { %v1121_v30 = vsel %vm1105_vm6, %v2447_v58, %v1089_v12  ;;  %v1027_v28 = vmul.f32 %v1011_v22, %v2509_v24  ;;  %vm979_vm9 = vcmp.gt.f32.partialorder %v2509_v24, -0.001  ;;  %vm1107_vm10 = vcmp.gt.f32.partialorder %v2498_v39, 0.0 }
 0x33e   :  { %1898 = vmatpush3.bf16.msra.mxu0 %v1897_v8  ;;  %v1088_v26 = vsel %vm976_vm7, %v1024_v54, %v1226_v21  ;;  %1980 = vpow2.f32 %v1058_v9  ;;  %v1026_v58 = vmul.f32 %v1010_v4, %v2512_v47  ;;  %vm978_vm11 = vcmp.gt.f32.partialorder %v2512_v47, -0.001 }
 0x33f   :  { %1899 = vmatprep.subr.bf16.mxu0 %v2106_v25  ;;  %v1120_v27 = vsel %vm1104_vm8, %v2470_v20, %v1088_v26  ;;  %v1013_v10 = vadd.f32 1.0, %v997_v19  ;;  %v996_v33 = vmul.f32 0.5, %v964_v53  ;;  %vm1106_vm12 = vcmp.gt.f32.partialorder %v2503_v0, 0.0 }
 0x340   :  { %v1975_v6 = vpop.eup %1974  ;;  %v1900_v7 = vpack.c.bf16 %v1121_v30, %v1120_v27  ;;  %vm981_vm13 = vcmp.gt.f32.partialorder %v2517_v36, -0.001  ;;  %vm1109_vm14 = vcmp.gt.f32.partialorder %v2506_v23, 0.0  ;;  %vm980_vm15 = vcmp.gt.f32.partialorder %v964_v53, -0.001 }
 0x341   :  { %v1977_v15 = vpop.eup %1976  ;;  %v1229_v29 = vadd.f32 -1.0, %v1975_v6  ;;  %v1029_v38 = vmul.f32 %v1013_v10, %v2517_v36  ;;  %v1012_v13 = vadd.f32 1.0, %v996_v33  ;;  %vm1108_vm0 = vcmp.gt.f32.partialorder %v948_v44, 0.0 }
 0x342   :  { %v1228_v32 = vadd.f32 -1.0, %v1977_v15  ;;  %1901 = vmatpush3.bf16.msra.mxu0 %v1900_v7  ;;  %v1979_v20 = vpop.eup %1978 }
 0x343   :  { %v1091_v51 = vsel %vm979_vm9, %v1027_v28, %v1229_v29  ;;  %1902 = vmatprep.subr.bf16.mxu0 %v2106_v25  ;;  %v1231_v2 = vadd.f32 -1.0, %v1979_v20 }
 0x344   :  { %v1123_v11 = vsel %vm1107_vm10, %v2498_v39, %v1091_v51  ;;  %v1090_v34 = vsel %vm978_vm11, %v1026_v58, %v1228_v32  ;;  %v1028_v39 = vmul.f32 %v1012_v13, %v964_v53 }
 0x345   :  { %v1122_v3 = vsel %vm1106_vm12, %v2503_v0, %v1090_v34  ;;  %v1093_v14 = vsel %vm981_vm13, %v1029_v38, %v1231_v2 }
 0x346   :  { %v1903_v35 = vpack.c.bf16 %v1123_v11, %v1122_v3  ;;  %v1125_v45 = vsel %vm1109_vm14, %v2506_v23, %v1093_v14 }
 0x348   :  { %1904 = vmatpush3.bf16.msra.mxu0 %v1903_v35  ;;  %v1981_v40 = vpop.eup %1980 }
 0x349   :  { %1905 = vmatprep.subr.bf16.mxu0 %v2106_v25  ;;  %v1230_v41 = vadd.f32 -1.0, %v1981_v40 }
 0x34b   :  { %v1092_v0 = vsel %vm980_vm15, %v1028_v39, %v1230_v41 }
 0x34c   :  { %v1124_v24 = vsel %vm1108_vm0, %v948_v44, %v1092_v0 }
 0x34d   :  { %v1906_v47 = vpack.c.bf16 %v1125_v45, %v1124_v24 }
 0x34f   :  { %1907 = vmatpush3.bf16.msra.mxu0 %v1906_v47 }
 0x352   :  { %1722 = vmatmul.mubr.f32.vlgmr.msra.gmra.mrb[32].mxu0 %v1126_v42 }
 0x425   :  { %v1193_v18 = vpop.f32.mrb[32].mxu0 }
 0x426   :  { %1197 = vst [vmem:[#allocation10] sm:$0xff] %v1193_v18  ;;  %v1723_v25 = vpop.f32.mrb[33].mxu0 }
 0x427   :  { %2081 = shalt.err (!%p2078_p8)
}
 0x428   :  { %s2082_s19 = scalar_lea.hbm %s2576_s5, 128 }
 0x429   :  { %p2083_p9 = scmp.ne.s32.totalorder %s2576_s5, %s2082_s19  ;;  %p2086_p10 = scmp.lt.u32.totalorder %s2082_s19, %s2576_s5 }
 0x42b   :  { %p2088_p11 = pnand %p2086_p10, %p2083_p9 }
 0x42d   :  { %2091 = shalt.err (!%p2088_p11)
}
 0x42e   :  { %1207 = dma.vmem_to_hbm [thread:$0]  %s1205_s16, 128, %s2576_s5, [#allocation4]  }
 0x42f   :  { %2098 = dma.done.wait [#allocation4], 128  }
 0x430   :  { %2099 = vsyncadd [#allocation4], 4294967168 }
 0x431   :  { %1211 = vsyncpa [#allocation3], 1 }
 0x432   :  { %1212 = vsyncpa [#allocation6], 1 }
 0x433   :  { %1213 = vsyncpa [#allocation9], 1 }
 0x434   :  { %1214 = vsyncpa [#allocation4], 1 }

</bundles_post_ra>
